<compile_context>
chip_gen: v5e
topology: v5e:2x2
jax: 0.10.0
libtpu: 0.0.40
codegen_flags: <defaults>
</compile_context>

<pallas_src>
import math
import numpy as np
import jax
import jax.numpy as jnp
from jax.experimental import pallas as pl
from jax.experimental.pallas import tpu as pltpu


def make_self_attention_kernel(R, C, n_head):
    """R = rows handled per grid step (= B_blk * T)."""
    assert C % n_head == 0
    hd = C // n_head
    scale = 1.0 / math.sqrt(hd)

    def kernel(x_ref, wqkv_ref, bqkv_ref, wproj_ref, bproj_ref,
               hmask_ref, bias_ref, o_ref):
        # ---- fused QKV projection on the flattened (R, C) slab ----
        x_bf = x_ref[...].astype(jnp.bfloat16)                                # (R, C)
        qkv = jnp.dot(x_bf, wqkv_ref[...],
                      preferred_element_type=jnp.float32) + bqkv_ref[...]     # (R, 3C) f32

        q = qkv[:, 0 * C:1 * C] * scale                                       # (R, C) f32
        k_bf = qkv[:, 1 * C:2 * C].astype(jnp.bfloat16)                       # (R, C)
        v_bf = qkv[:, 2 * C:3 * C].astype(jnp.bfloat16)                       # (R, C)

        # ---- all heads (and batch rows) in one shot via head-masked replication ----
        # q_rep[h*R + r, c] = q[r, c] if column c belongs to head h else 0, so a single
        # contraction over C yields every head's (R, R) score block stacked along rows.
        q_rep = (hmask_ref[...] * q[None, :, :]).reshape(n_head * R, C)       # (n_head*R, C)
        s = jnp.einsum('md,nd->mn', q_rep.astype(jnp.bfloat16), k_bf,
                       preferred_element_type=jnp.float32)                    # (n_head*R, R)
        s = s + bias_ref[...]          # additive causal + same-batch-row mask (0 / -1e30)

        # numerically stable softmax (all f32), denominator on the EUP
        m = jnp.max(s, axis=-1, keepdims=True)
        p = jnp.exp(s - m)
        denom = jnp.sum(p, axis=-1, keepdims=True)
        p = p * pl.reciprocal(denom, approx=True)

        # one matmul for every head's output, then merge heads with a masked sum over
        # the head axis (row block h contributes only its own column block h).
        y_all = jnp.dot(p.astype(jnp.bfloat16), v_bf,
                        preferred_element_type=jnp.float32)                   # (n_head*R, C)
        y = jnp.sum(y_all.reshape(n_head, R, C) * hmask_ref[...], axis=0)     # (R, C) f32

        # ---- output projection ----
        out = jnp.dot(y.astype(jnp.bfloat16), wproj_ref[...],
                      preferred_element_type=jnp.float32) + bproj_ref[...]    # (R, C)
        o_ref[...] = out.astype(o_ref.dtype)

    return kernel


def self_attention(x, w_qkv, b_qkv, w_proj, b_proj, n_head, *, num_blocks=1):
    """x: (B, T, C) f32.  w_qkv: (C, 3C), b_qkv: (3C,), w_proj: (C, C), b_proj: (C,).

    num_blocks: grid steps along the batch.  1 (default) folds the whole batch into a
    single fused step — best on single-TensorCore v5e/v6e.  Use 2 on v7x so the
    "parallel" grid axis can shard the two halves across both TensorCores.
    """
    B, T, C = x.shape
    assert C % n_head == 0 and B % num_blocks == 0
    hd = C // n_head
    B_blk = B // num_blocks
    R = B_blk * T                                  # rows per grid step

    # Weights shipped in bf16 (MXU-native, half the DMA/VMEM bytes); biases stay f32.
    w_qkv_bf = w_qkv.astype(jnp.bfloat16)
    w_proj_bf = w_proj.astype(jnp.bfloat16)
    b_qkv2 = b_qkv.reshape(1, 3 * C).astype(jnp.float32)
    b_proj2 = b_proj.reshape(1, C).astype(jnp.float32)

    # Constant masks, built host-side (tiny; avoids in-kernel integer index math).
    # head_mask[h, 0, c] = 1.0 iff column c belongs to head h.
    head_mask = (np.arange(C)[None, :] // hd == np.arange(n_head)[:, None])
    head_mask = head_mask.astype(np.float32).reshape(n_head, 1, C)
    # attn_bias[h*R + r, r'] = 0 iff rows r, r' are the same batch row of the block and
    # the key position <= query position, else -1e30 (additive mask before softmax).
    rb = np.arange(R) // T
    rq = np.arange(R) % T
    allowed = (rb[:, None] == rb[None, :]) & (rq[:, None] >= rq[None, :])
    attn_bias = np.tile(np.where(allowed, 0.0, -1e30).astype(np.float32),
                        (n_head, 1))                                   # (n_head*R, R)

    # 2-D (B*T, C) views of x / out: free row-major reshapes in the wrapper.
    x2 = x.reshape(B * T, C)

    kernel = make_self_attention_kernel(R, C, n_head)

    out2 = pl.pallas_call(
        kernel,
        out_shape=jax.ShapeDtypeStruct((B * T, C), x.dtype),
        grid_spec=pltpu.PrefetchScalarGridSpec(
            num_scalar_prefetch=0,
            grid=(num_blocks,),
            in_specs=[
                pl.BlockSpec((R, C), lambda i: (i, 0)),               # x rows
                pl.BlockSpec((C, 3 * C), lambda i: (0, 0)),           # w_qkv (bf16)
                pl.BlockSpec((1, 3 * C), lambda i: (0, 0)),           # b_qkv
                pl.BlockSpec((C, C), lambda i: (0, 0)),               # w_proj (bf16)
                pl.BlockSpec((1, C), lambda i: (0, 0)),               # b_proj
                pl.BlockSpec((n_head, 1, C), lambda i: (0, 0, 0)),    # head mask
                pl.BlockSpec((n_head * R, R), lambda i: (0, 0)),      # attn bias
            ],
            out_specs=pl.BlockSpec((R, C), lambda i: (i, 0)),
        ),
        # Batch blocks are independent -> shard across TensorCores when num_blocks > 1
        # (v7x has 2 TCs); harmless on v5e/v6e.
        compiler_params=pltpu.CompilerParams(
            dimension_semantics=("parallel",)),
    )(x2, w_qkv_bf, b_qkv2, w_proj_bf, b_proj2,
      jnp.asarray(head_mask), jnp.asarray(attn_bias))

    return out2.reshape(B, T, C)


def self_attention_ref(x, w_qkv, b_qkv, w_proj, b_proj, n_head):
    """Pure-JAX f32 reference mirroring the PyTorch forward."""
    B, T, C = x.shape
    hd = C // n_head
    qkv = x @ w_qkv + b_qkv                                           # (B, T, 3C)
    q, k, v = jnp.split(qkv, 3, axis=2)
    q = q.reshape(B, T, n_head, hd).transpose(0, 2, 1, 3)
    k = k.reshape(B, T, n_head, hd).transpose(0, 2, 1, 3)
    v = v.reshape(B, T, n_head, hd).transpose(0, 2, 1, 3)
    s = jnp.einsum("bhqd,bhkd->bhqk", q, k) / math.sqrt(hd)
    causal = jnp.tril(jnp.ones((T, T), dtype=bool))
    s = jnp.where(causal[None, None], s, -1e30)
    p = jax.nn.softmax(s, axis=-1)
    y = jnp.einsum("bhqk,bhkd->bhqd", p, v)
    y = y.transpose(0, 2, 1, 3).reshape(B, T, C)
    return y @ w_proj + b_proj


if __name__ == "__main__":
    # Config consistent with the module: B=2, T=8, C=n_embd=32, n_head=4
    B, T, C, n_head = 2, 8, 32, 4

    key = jax.random.PRNGKey(0)
    kx, k1, k2, k3, k4 = jax.random.split(key, 5)

    x = jax.random.normal(kx, (B, T, C), dtype=jnp.float32)

    # Deterministic parameter init (Linear weights stored as (in, out), i.e. W.T)
    w_qkv = jax.random.normal(k1, (C, 3 * C), dtype=jnp.float32) * 0.02
    b_qkv = jax.random.normal(k2, (3 * C,), dtype=jnp.float32) * 0.02
    w_proj = jax.random.normal(k3, (C, C), dtype=jnp.float32) * 0.02
    b_proj = jax.random.normal(k4, (C,), dtype=jnp.float32) * 0.02

    out = self_attention(x, w_qkv, b_qkv, w_proj, b_proj, n_head)   # num_blocks=1 (v5e/v6e); pass 2 on v7x
    out = jax.block_until_ready(out)

    ref = self_attention_ref(x, w_qkv, b_qkv, w_proj, b_proj, n_head)
    assert out.shape == (B, T, C)
    # bf16 MXU operands (f32 accumulation) + approx reciprocal -> bf16-level tolerance.
    assert jnp.allclose(out, ref, atol=1e-2, rtol=1e-2), "mismatch vs reference"

    print("KERNEL_OK")
</pallas_src>

<mosaic_0001>
module attributes {stable_mosaic.version = 11 : i64} {
  func.func @kernel(%arg0: i32, %arg1: memref<16x32xf32, #tpu.memory_space<vmem>>, %arg2: memref<32x96xbf16, #tpu.memory_space<vmem>>, %arg3: memref<1x96xf32, #tpu.memory_space<vmem>>, %arg4: memref<32x32xbf16, #tpu.memory_space<vmem>>, %arg5: memref<1x32xf32, #tpu.memory_space<vmem>>, %arg6: memref<4x1x32xf32, #tpu.memory_space<vmem>>, %arg7: memref<64x16xf32, #tpu.memory_space<vmem>>, %arg8: memref<16x32xf32, #tpu.memory_space<vmem>>) attributes {dimension_semantics = [#tpu.dimension_semantics<parallel>], iteration_bounds = array<i64: 1>, scalar_prefetch = 0 : i64, scratch_operands = 0 : i64, tpu.core_type = #tpu.core_type<tc>, window_params = [{transform_indices = @transform_0, window_bounds = array<i64: 16, 32>}, {pipeline_mode = #tpu.pipeline_mode<synchronous>, transform_indices = @transform_1, window_bounds = array<i64: 32, 96>}, {pipeline_mode = #tpu.pipeline_mode<synchronous>, transform_indices = @transform_2, window_bounds = array<i64: 1, 96>}, {pipeline_mode = #tpu.pipeline_mode<synchronous>, transform_indices = @transform_3, window_bounds = array<i64: 32, 32>}, {pipeline_mode = #tpu.pipeline_mode<synchronous>, transform_indices = @transform_4, window_bounds = array<i64: 1, 32>}, {pipeline_mode = #tpu.pipeline_mode<synchronous>, transform_indices = @transform_5, window_bounds = array<i64: 4, 1, 32>}, {pipeline_mode = #tpu.pipeline_mode<synchronous>, transform_indices = @transform_6, window_bounds = array<i64: 64, 16>}, {transform_indices = @transform_7, window_bounds = array<i64: 16, 32>}]} {
    %c0 = arith.constant 0 : index
    %c0_0 = arith.constant 0 : index
    %0 = vector.load %arg1[%c0, %c0_0] : memref<16x32xf32, #tpu.memory_space<vmem>>, vector<16x32xf32>
    %1 = arith.truncf %0 : vector<16x32xf32> to vector<16x32xbf16>
    %c0_1 = arith.constant 0 : index
    %c0_2 = arith.constant 0 : index
    %2 = vector.load %arg2[%c0_1, %c0_2] : memref<32x96xbf16, #tpu.memory_space<vmem>>, vector<32x96xbf16>
    %cst = arith.constant dense<0.000000e+00> : vector<16x96xf32>
    %3 = tpu.matmul %1, %2, %cst {dimension_numbers = #tpu.dot_dimension_numbers<[1], [0], [0], [1], [0, 0, 1, 1], [], []>} : vector<16x32xbf16>, vector<32x96xbf16>, vector<16x96xf32> -> vector<16x96xf32>
    %c0_3 = arith.constant 0 : index
    %c0_4 = arith.constant 0 : index
    %4 = vector.load %arg3[%c0_3, %c0_4] : memref<1x96xf32, #tpu.memory_space<vmem>>, vector<1x96xf32>
    %5 = vector.broadcast %4 : vector<1x96xf32> to vector<16x96xf32>
    %6 = arith.addf %3, %5 : vector<16x96xf32>
    %7 = vector.extract_strided_slice %6 {offsets = [0, 0], sizes = [16, 32], strides = [1, 1]} : vector<16x96xf32> to vector<16x32xf32>
    %cst_5 = arith.constant 0.353553385 : f32
    %8 = vector.broadcast %cst_5 : f32 to vector<16x32xf32>
    %9 = arith.mulf %7, %8 : vector<16x32xf32>
    %10 = vector.extract_strided_slice %6 {offsets = [0, 32], sizes = [16, 32], strides = [1, 1]} : vector<16x96xf32> to vector<16x32xf32>
    %11 = arith.truncf %10 : vector<16x32xf32> to vector<16x32xbf16>
    %12 = vector.extract_strided_slice %6 {offsets = [0, 64], sizes = [16, 32], strides = [1, 1]} : vector<16x96xf32> to vector<16x32xf32>
    %13 = arith.truncf %12 : vector<16x32xf32> to vector<16x32xbf16>
    %c0_6 = arith.constant 0 : index
    %c0_7 = arith.constant 0 : index
    %c0_8 = arith.constant 0 : index
    %14 = vector.load %arg6[%c0_6, %c0_7, %c0_8] : memref<4x1x32xf32, #tpu.memory_space<vmem>>, vector<4x1x32xf32>
    %15 = vector.shape_cast %9 : vector<16x32xf32> to vector<1x16x32xf32>
    %16 = vector.broadcast %14 : vector<4x1x32xf32> to vector<4x16x32xf32>
    %17 = vector.broadcast %15 : vector<1x16x32xf32> to vector<4x16x32xf32>
    %18 = arith.mulf %16, %17 : vector<4x16x32xf32>
    %19 = vector.shape_cast %18 : vector<4x16x32xf32> to vector<64x32xf32>
    %20 = arith.truncf %19 : vector<64x32xf32> to vector<64x32xbf16>
    "tpu.trace_start"() <{level = 10 : i32, message = "md,nd->mn"}> : () -> ()
    %cst_9 = arith.constant dense<0.000000e+00> : vector<64x16xf32>
    %21 = tpu.matmul %20, %11, %cst_9 {dimension_numbers = #tpu.dot_dimension_numbers<[1], [1], [0], [0], [0, 0, 1, 0], [], []>} : vector<64x32xbf16>, vector<16x32xbf16>, vector<64x16xf32> -> vector<64x16xf32>
    "tpu.trace_stop"() : () -> ()
    %c0_10 = arith.constant 0 : index
    %c0_11 = arith.constant 0 : index
    %22 = vector.load %arg7[%c0_10, %c0_11] : memref<64x16xf32, #tpu.memory_space<vmem>>, vector<64x16xf32>
    %23 = arith.addf %21, %22 : vector<64x16xf32>
    %cst_12 = arith.constant dense<0xFF800000> : vector<64xf32>
    %24 = vector.multi_reduction <maximumf>, %23, %cst_12 [1] : vector<64x16xf32> to vector<64xf32>
    %25 = vector.shape_cast %24 : vector<64xf32> to vector<64x1xf32>
    %26 = vector.broadcast %25 : vector<64x1xf32> to vector<64x16xf32>
    %27 = arith.subf %23, %26 : vector<64x16xf32>
    %28 = math.exp %27 : vector<64x16xf32>
    %cst_13 = arith.constant dense<0.000000e+00> : vector<64xf32>
    %29 = vector.multi_reduction <add>, %28, %cst_13 [1] : vector<64x16xf32> to vector<64xf32>
    %30 = vector.shape_cast %29 : vector<64xf32> to vector<64x1xf32>
    %31 = tpu.reciprocal %30 {approx = true} : vector<64x1xf32> -> vector<64x1xf32>
    %32 = vector.broadcast %31 : vector<64x1xf32> to vector<64x16xf32>
    %33 = arith.mulf %28, %32 : vector<64x16xf32>
    %34 = arith.truncf %33 : vector<64x16xf32> to vector<64x16xbf16>
    %cst_14 = arith.constant dense<0.000000e+00> : vector<64x32xf32>
    %35 = tpu.matmul %34, %13, %cst_14 {dimension_numbers = #tpu.dot_dimension_numbers<[1], [0], [0], [1], [0, 0, 1, 1], [], []>} : vector<64x16xbf16>, vector<16x32xbf16>, vector<64x32xf32> -> vector<64x32xf32>
    %36 = vector.shape_cast %35 : vector<64x32xf32> to vector<4x16x32xf32>
    %c0_15 = arith.constant 0 : index
    %c0_16 = arith.constant 0 : index
    %c0_17 = arith.constant 0 : index
    %37 = vector.load %arg6[%c0_15, %c0_16, %c0_17] : memref<4x1x32xf32, #tpu.memory_space<vmem>>, vector<4x1x32xf32>
    %38 = vector.broadcast %37 : vector<4x1x32xf32> to vector<4x16x32xf32>
    %39 = arith.mulf %36, %38 : vector<4x16x32xf32>
    %cst_18 = arith.constant dense<0.000000e+00> : vector<16x32xf32>
    %40 = vector.multi_reduction <add>, %39, %cst_18 [0] : vector<4x16x32xf32> to vector<16x32xf32>
    %41 = arith.truncf %40 : vector<16x32xf32> to vector<16x32xbf16>
    %c0_19 = arith.constant 0 : index
    %c0_20 = arith.constant 0 : index
    %42 = vector.load %arg4[%c0_19, %c0_20] : memref<32x32xbf16, #tpu.memory_space<vmem>>, vector<32x32xbf16>
    %cst_21 = arith.constant dense<0.000000e+00> : vector<16x32xf32>
    %43 = tpu.matmul %41, %42, %cst_21 {dimension_numbers = #tpu.dot_dimension_numbers<[1], [0], [0], [1], [0, 0, 1, 1], [], []>} : vector<16x32xbf16>, vector<32x32xbf16>, vector<16x32xf32> -> vector<16x32xf32>
    %c0_22 = arith.constant 0 : index
    %c0_23 = arith.constant 0 : index
    %44 = vector.load %arg5[%c0_22, %c0_23] : memref<1x32xf32, #tpu.memory_space<vmem>>, vector<1x32xf32>
    %45 = vector.broadcast %44 : vector<1x32xf32> to vector<16x32xf32>
    %46 = arith.addf %43, %45 : vector<16x32xf32>
    %c0_24 = arith.constant 0 : index
    %c0_25 = arith.constant 0 : index
    %47 = vector.load %arg8[%c0_24, %c0_25] : memref<16x32xf32, #tpu.memory_space<vmem>>, vector<16x32xf32>
    tpu.vector_store %arg8[%c0_24, %c0_25], %46 {strides = array<i32>} : memref<16x32xf32, #tpu.memory_space<vmem>>, vector<16x32xf32>,
    return
  }
  func.func @transform_0(%arg0: i32) -> (i32, i32) {
    %c0_i32 = arith.constant 0 : i32
    %c0_i32_0 = arith.constant 0 : i32
    return %arg0, %c0_i32 : i32, i32
  }
  func.func @transform_1(%arg0: i32) -> (i32, i32) {
    %c0_i32 = arith.constant 0 : i32
    %c0_i32_0 = arith.constant 0 : i32
    %c0_i32_1 = arith.constant 0 : i32
    return %c0_i32, %c0_i32_0 : i32, i32
  }
  func.func @transform_2(%arg0: i32) -> (i32, i32) {
    %c0_i32 = arith.constant 0 : i32
    %c0_i32_0 = arith.constant 0 : i32
    %c0_i32_1 = arith.constant 0 : i32
    return %c0_i32, %c0_i32_0 : i32, i32
  }
  func.func @transform_3(%arg0: i32) -> (i32, i32) {
    %c0_i32 = arith.constant 0 : i32
    %c0_i32_0 = arith.constant 0 : i32
    %c0_i32_1 = arith.constant 0 : i32
    return %c0_i32, %c0_i32_0 : i32, i32
  }
  func.func @transform_4(%arg0: i32) -> (i32, i32) {
    %c0_i32 = arith.constant 0 : i32
    %c0_i32_0 = arith.constant 0 : i32
    %c0_i32_1 = arith.constant 0 : i32
    return %c0_i32, %c0_i32_0 : i32, i32
  }
  func.func @transform_5(%arg0: i32) -> (i32, i32, i32) {
    %c0_i32 = arith.constant 0 : i32
    %c0_i32_0 = arith.constant 0 : i32
    %c0_i32_1 = arith.constant 0 : i32
    %c0_i32_2 = arith.constant 0 : i32
    return %c0_i32, %c0_i32_0, %c0_i32_1 : i32, i32, i32
  }
  func.func @transform_6(%arg0: i32) -> (i32, i32) {
    %c0_i32 = arith.constant 0 : i32
    %c0_i32_0 = arith.constant 0 : i32
    %c0_i32_1 = arith.constant 0 : i32
    return %c0_i32, %c0_i32_0 : i32, i32
  }
  func.func @transform_7(%arg0: i32) -> (i32, i32) {
    %c0_i32 = arith.constant 0 : i32
    %c0_i32_0 = arith.constant 0 : i32
    return %arg0, %c0_i32 : i32, i32
  }
}

</mosaic_0001>

<bundles_post_ra>
// kernel: tpu_custom_call.1
= control target key start
LH: loop header
LB: loop body
LE: loop exit
PB: predicated region body
PF: predicated region fallthrough
CT: control target
= control target key end

     0   :  { %s654_s0 = inlined_call_operand.vmem [shape: f32[16,32], index: 0, kind: input, shape index: {}]   ;;  %s655_s1 = inlined_call_operand.vmem [shape: bf16[32,96], index: 1, kind: input, shape index: {}]   ;;  %s656_s2 = inlined_call_operand.vmem [shape: f32[1,96], index: 2, kind: input, shape index: {}]   ;;  %s657_s3 = inlined_call_operand.vmem [shape: bf16[32,32], index: 3, kind: input, shape index: {}]   ;;  %s658_s4 = inlined_call_operand.vmem [shape: f32[1,32], index: 4, kind: input, shape index: {}]   ;;  %s659_s5 = inlined_call_operand.vmem [shape: f32[4,1,32], index: 5, kind: input, shape index: {}]   ;;  %s660_s6 = inlined_call_operand.vmem [shape: f32[64,16], index: 6, kind: input, shape index: {}]   ;;  %s661_s7 = inlined_call_operand.hbm [shape: f32[16,32], index: 7, kind: output, shape index: {}]  }
   0x1   :  { %v415_v0 = vld [vmem:[%s655_s1 + $0x8] sm:$0xff]  ;;  %v414_v1 = vld [vmem:[%s655_s1] sm:$0xff] }
   0x2   :  { %v28_v2 = vld [vmem:[%s654_s0] sm:$0xff]  ;;  %v29_v3 = vld [vmem:[%s654_s0 + $0x8] sm:$0xff]  ;;  %61 = vmatpush.bf16.msra.mxu0 %v415_v0 }
   0x3   :  { %v30_v4 = vpack.c.bf16 %v29_v3, %v28_v2 }
   0x4   :  { %12 = vsyncpa [#allocation3], 0  ;;  %vm51_vm0 = vcmask 261120   ;;  %v425_v5 = vld [vmem:[%s656_s2] ss:$0 sm:$0xff]  ;;  %s493_s2 = smov 96  }
   0x5   :  { %v426_v8 = vld [vmem:[%s659_s5] ss:$0 sm:$0xff]  ;;  %v427_v9 = vld [vmem:[%s659_s5 + $0x1] ss:$0 sm:$0xff]  ;;  %v428_v12 = vld [vmem:[%s659_s5 + $0x2] ss:$0 sm:$0xff] }
   0x6   :  { %62 = vmatpush.bf16.msra.mxu0 %v414_v1  ;;  %v429_v13 = vld [vmem:[%s659_s5 + $0x3] ss:$0 sm:$0xff]  ;;  %vm155_vm1 = vcmask 130048   ;;  %v101_v36 = vld [vmem:[%s660_s6 + $0x8] sm:$0xff]  ;;  %v103_v37 = vld [vmem:[%s660_s6 + $0x18] sm:$0xff]  ;;  %s495_s19 = smov [#allocation2]  }
   0x7   :  { %v100_v31 = vld [vmem:[%s660_s6] sm:$0xff]  ;;  %v102_v44 = vld [vmem:[%s660_s6 + $0x10] sm:$0xff]  ;;  %v105_v51 = vld [vmem:[%s660_s6 + $0x28] sm:$0xff]  ;;  %s374_s20 = sshll.u32 %s495_s19, 4  ;;  %s376_s23 = sshll.u32 %s661_s7, 4  ;;  %s375_s20 = int_to_ptr.vmem [resolvable:$true] %s374_s20  ;;  %s377_s23 = int_to_ptr.hbm [resolvable:$true] %s376_s23 }
   0x8   :  { %v104_v45 = vld [vmem:[%s660_s6 + $0x20] sm:$0xff]  ;;  %v106_v55 = vld [vmem:[%s660_s6 + $0x30] sm:$0xff]  ;;  %v107_v59 = vld [vmem:[%s660_s6 + $0x38] sm:$0xff]  ;;  %s494_s6 = smov 64   ;;  %s496_s24 = smov 128  }
   0x9   :  { %396 = vmatmul.msk.bf16.vlgmr.msra.gmra.mxu0 %vm51_vm0, %v30_v4  ;;  %s497_s25 = smov 8  }
  0x86   :  { %v64_v6 = vpop.f32.mrf.mxu0 }
  0x87   :  { %v65_v7 = vadd.f32 %v425_v5, %v64_v6 }
  0x89   :  { %v69_v10 = vmul.f32 0.35355338, %v65_v7 }
  0x8b   :  { %v88_v17 = vmul.f32 %v426_v8, %v69_v10  ;;  %v90_v18 = vmul.f32 %v427_v9, %v69_v10  ;;  %v92_v19 = vmul.f32 %v428_v12, %v69_v10  ;;  %v94_v20 = vmul.f32 %v429_v13, %v69_v10 }
  0x8e   :  { %v66_v11 = vpop.f32.mrf.mxu0 }
  0x8f   :  { %v67_v14 = vadd.f32 %v425_v5, %v66_v11 }
  0x91   :  { %v70_v15 = vmul.f32 0.35355338, %v67_v14  ;;  %v566_v16 = vpack.c.bf16 %v67_v14, %v65_v7 }
  0x93   :  { %109 = vrot.lane.b32.xlu0 %v566_v16, %s493_s2  ;;  %v89_v21 = vmul.f32 %v426_v8, %v70_v15  ;;  %v91_v22 = vmul.f32 %v427_v9, %v70_v15  ;;  %v93_v23 = vmul.f32 %v428_v12, %v70_v15  ;;  %v95_v24 = vmul.f32 %v429_v13, %v70_v15 }
  0x95   :  { %v96_v25 = vpack.c.bf16 %v89_v21, %v88_v17  ;;  %v97_v26 = vpack.c.bf16 %v91_v22, %v90_v18  ;;  %v98_v27 = vpack.c.bf16 %v93_v23, %v92_v19  ;;  %v99_v28 = vpack.c.bf16 %v95_v24, %v94_v20 }
 0x105   :  { %v110_v29 = vpop.permute.xlu0 %109 }
 0x106   :  { %v124_v30 = vsel %vm51_vm0, %v110_v29, 0 }
 0x107   :  { %133 = vmatpush.bf16.xpose.msrb.mxu0 %v124_v30  ;;  %418 = vmatpush.bf16.xpose.msra.mxu1 %v124_v30 }
 0x10e   :  { %397 = vmatmul.msk.bf16.vlgmr.msrb.gmra.mxu0 %vm51_vm0, %v96_v25  ;;  %398 = vmatmul.msk.bf16.vlgmr.msra.gmra.mxu1 %vm51_vm0, %v97_v26 }
 0x11e   :  { %399 = vmatmul.msk.bf16.gmra.mxu1 %vm51_vm0, %v98_v27 }
 0x12e   :  { %400 = vmatmul.msk.bf16.gmra.mxu1 %vm51_vm0, %v99_v28 }
 0x18b   :  { %v135_v32 = vpop.f32.mrf.mxu0  ;;  %v140_v33 = vpop.f32.mrf.mxu1 }
 0x18c   :  { %v136_v34 = vadd.f32 %v135_v32, %v100_v31  ;;  %v141_v46 = vadd.f32 %v140_v33, %v102_v44 }
 0x18e   :  { %v156_v35 = vsel %vm155_vm1, %v136_v34, -inf  ;;  %v162_v50 = vsel %vm155_vm1, %v141_v46, -inf }
 0x18f   :  { %157 = vmax.xlane.f32.xlu0 %v156_v35 }
 0x193   :  { %v137_v38 = vpop.f32.mrf.mxu0  ;;  %v142_v39 = vpop.f32.mrf.mxu1 }
 0x194   :  { %v138_v40 = vadd.f32 %v137_v38, %v101_v36  ;;  %v143_v41 = vadd.f32 %v142_v39, %v103_v37 }
 0x196   :  { %v165_v42 = vsel %vm155_vm1, %v143_v41, -inf  ;;  %v159_v43 = vsel %vm155_vm1, %v138_v40, -inf }
 0x197   :  { %166 = vmax.xlane.f32.xlu2 %v165_v42  ;;  %160 = vmax.xlane.f32.xlu1 %v159_v43 }
 0x19b   :  { %v145_v47 = vpop.f32.mrf.mxu1 }
 0x19c   :  { %v146_v48 = vadd.f32 %v145_v47, %v104_v45 }
 0x19e   :  { %v168_v49 = vsel %vm155_vm1, %v146_v48, -inf }
 0x19f   :  { %169 = vmax.xlane.f32.xlu2 %v168_v49  ;;  %163 = vmax.xlane.f32.xlu1 %v162_v50 }
 0x1a3   :  { %v147_v52 = vpop.f32.mrf.mxu1 }
 0x1a4   :  { %v148_v53 = vadd.f32 %v147_v52, %v105_v51 }
 0x1a6   :  { %v171_v54 = vsel %vm155_vm1, %v148_v53, -inf }
 0x1a7   :  { %172 = vmax.xlane.f32.xlu1 %v171_v54 }
 0x1ab   :  { %v150_v56 = vpop.f32.mrf.mxu1 }
 0x1ac   :  { %v151_v57 = vadd.f32 %v150_v56, %v106_v55 }
 0x1ae   :  { %v174_v58 = vsel %vm155_vm1, %v151_v57, -inf }
 0x1af   :  { %175 = vmax.xlane.f32.xlu2 %v174_v58 }
 0x1b3   :  { %v152_v60 = vpop.f32.mrf.mxu1 }
 0x1b4   :  { %v153_v61 = vadd.f32 %v152_v60, %v107_v59 }
 0x1b6   :  { %v177_v62 = vsel %vm155_vm1, %v153_v61, -inf }
 0x1b7   :  { %178 = vmax.xlane.f32.xlu1 %v177_v62 }
 0x202   :  { %v158_v63 = vpop.xlane.xlu0 %157 }
 0x203   :  { %v180_v0 = vsub.f32 %v136_v34, %v158_v63 }
 0x205   :  { %v188_v1 = vmul.f32 1.442695, %v180_v0 }
 0x207   :  { %435 = vpow2.f32 %v188_v1 }
 0x20a   :  { %v167_v2 = vpop.xlane.xlu2 %166  ;;  %v161_v3 = vpop.xlane.xlu1 %160 }
 0x20b   :  { %v181_v4 = vsub.f32 %v138_v40, %v161_v3  ;;  %v183_v15 = vsub.f32 %v143_v41, %v167_v2 }
 0x20d   :  { %v436_v5 = vpop.eup %435  ;;  %v190_v6 = vmul.f32 1.442695, %v181_v4  ;;  %v194_v18 = vmul.f32 1.442695, %v183_v15 }
 0x20e   :  { %v204_v7 = vsel %vm155_vm1, %v436_v5, 0.0 }
 0x20f   :  { %205 = vadd.xlane.f32.xlu2 %v204_v7  ;;  %437 = vpow2.f32 %v190_v6  ;;  %v417_v7 = vld [vmem:[%s657_s3 + $0x8] sm:$0xff] }
 0x212   :  { %v170_v8 = vpop.xlane.xlu2 %169  ;;  %v164_v9 = vpop.xlane.xlu1 %163 }
 0x213   :  { %v184_v10 = vsub.f32 %v146_v48, %v170_v8  ;;  %v182_v11 = vsub.f32 %v141_v46, %v164_v9  ;;  %v416_v9 = vld [vmem:[%s657_s3] sm:$0xff] }
 0x215   :  { %v196_v12 = vmul.f32 1.442695, %v184_v10  ;;  %v192_v13 = vmul.f32 1.442695, %v182_v11  ;;  %v438_v14 = vpop.eup %437  ;;  %v431_v11 = vld [vmem:[%s659_s5 + $0x1] ss:$0 sm:$0xff] }
 0x216   :  { %v207_v17 = vsel %vm155_vm1, %v438_v14, 0.0 }
 0x217   :  { %439 = vpow2.f32 %v196_v12  ;;  %208 = vadd.xlane.f32.xlu1 %v207_v17  ;;  %v430_v12 = vld [vmem:[%s659_s5] ss:$0 sm:$0xff] }
 0x218   :  { %441 = vpow2.f32 %v192_v13  ;;  %v432_v13 = vld [vmem:[%s659_s5 + $0x2] ss:$0 sm:$0xff] }
 0x219   :  { %443 = vpow2.f32 %v194_v18 }
 0x21a   :  { %v173_v19 = vpop.xlane.xlu1 %172 }
 0x21b   :  { %v185_v22 = vsub.f32 %v148_v53, %v173_v19  ;;  %v433_v19 = vld [vmem:[%s659_s5 + $0x3] ss:$0 sm:$0xff] }
 0x21d   :  { %v440_v20 = vpop.eup %439  ;;  %v198_v25 = vmul.f32 1.442695, %v185_v22 }
 0x21e   :  { %v442_v21 = vpop.eup %441  ;;  %v216_v23 = vsel %vm155_vm1, %v440_v20, 0.0 }
 0x21f   :  { %v210_v24 = vsel %vm155_vm1, %v442_v21, 0.0  ;;  %217 = vadd.xlane.f32.xlu0 %v216_v23  ;;  %v444_v26 = vpop.eup %443  ;;  %445 = vpow2.f32 %v198_v25 }
 0x220   :  { %211 = vadd.xlane.f32.xlu1 %v210_v24  ;;  %v213_v27 = vsel %vm155_vm1, %v444_v26, 0.0 }
 0x222   :  { %v176_v35 = vpop.xlane.xlu2 %175 }
 0x223   :  { %v186_v36 = vsub.f32 %v151_v57, %v176_v35 }
 0x225   :  { %v446_v30 = vpop.eup %445  ;;  %v200_v37 = vmul.f32 1.442695, %v186_v36 }
 0x226   :  { %v219_v32 = vsel %vm155_vm1, %v446_v30, 0.0 }
 0x227   :  { %248 = vrot.lane.b32.xlu2 %v566_v16, %s494_s6 }
 0x228   :  { %214 = vadd.xlane.f32.xlu1 %v213_v27 }
 0x22a   :  { %v179_v28 = vpop.xlane.xlu1 %178 }
 0x22b   :  { %v187_v29 = vsub.f32 %v153_v61, %v179_v28 }
 0x22d   :  { %v202_v31 = vmul.f32 1.442695, %v187_v29 }
 0x22f   :  { %447 = vpow2.f32 %v202_v31 }
 0x230   :  { %220 = vadd.xlane.f32.xlu1 %v219_v32  ;;  %449 = vpow2.f32 %v200_v37 }
 0x235   :  { %v448_v33 = vpop.eup %447 }
 0x236   :  { %v225_v34 = vsel %vm155_vm1, %v448_v33, 0.0  ;;  %v450_v38 = vpop.eup %449 }
 0x237   :  { %226 = vadd.xlane.f32.xlu0 %v225_v34  ;;  %v222_v16 = vsel %vm155_vm1, %v450_v38, 0.0 }
 0x250   :  { %223 = vadd.xlane.f32.xlu2 %v222_v16 }
 0x282   :  { %v206_v39 = vpop.xlane.xlu2 %205 }
 0x283   :  { %451 = vrcp.f32 %v206_v39 }
 0x289   :  { %v452_v42 = vpop.eup %451 }
 0x28a   :  { %v249_v40 = vpop.permute.xlu2 %248  ;;  %v209_v41 = vpop.xlane.xlu1 %208  ;;  %v236_v45 = vmul.f32 %v452_v42, %v436_v5 }
 0x28b   :  { %270 = vmatpush.bf16.msra.mxu2 %v249_v40  ;;  %419 = vmatpush.bf16.msra.mxu3 %v249_v40  ;;  %453 = vrcp.f32 %v209_v41  ;;  %v434_v41 = vld [vmem:[%s658_s4] ss:$0 sm:$0xff] }
 0x28f   :  { %360 = vmatpush.bf16.msrb.mxu3 %v417_v7 }
 0x291   :  { %v454_v43 = vpop.eup %453 }
 0x292   :  { %v237_v46 = vmul.f32 %v454_v43, %v438_v14  ;;  %v218_v55 = vpop.xlane.xlu0 %217 }
 0x293   :  { %v212_v44 = vpop.xlane.xlu1 %211  ;;  %361 = vmatpush.bf16.msrb.mxu3 %v416_v9 }
 0x294   :  { %v244_v47 = vpack.c.bf16 %v237_v46, %v236_v45  ;;  %455 = vrcp.f32 %v212_v44 }
 0x296   :  { %401 = vmatmul.msk.bf16.vlgmr.msra.gmra.mxu2 %vm155_vm1, %v244_v47 }
 0x29a   :  { %v456_v49 = vpop.eup %455 }
 0x29b   :  { %v215_v48 = vpop.xlane.xlu1 %214  ;;  %v238_v51 = vmul.f32 %v456_v49, %v442_v21 }
 0x29c   :  { %457 = vrcp.f32 %v215_v48 }
 0x2a2   :  { %v458_v50 = vpop.eup %457 }
 0x2a3   :  { %v239_v52 = vmul.f32 %v458_v50, %v444_v26  ;;  %v221_v53 = vpop.xlane.xlu1 %220 }
 0x2a4   :  { %459 = vrcp.f32 %v221_v53 }
 0x2a5   :  { %v245_v54 = vpack.c.bf16 %v239_v52, %v238_v51  ;;  %461 = vrcp.f32 %v218_v55 }
 0x2a7   :  { %402 = vmatmul.msk.bf16.gmra.mxu2 %vm155_vm1, %v245_v54 }
 0x2aa   :  { %v460_v56 = vpop.eup %459  ;;  %v227_v61 = vpop.xlane.xlu0 %226 }
 0x2ab   :  { %v462_v57 = vpop.eup %461  ;;  %v241_v58 = vmul.f32 %v460_v56, %v446_v30  ;;  %463 = vrcp.f32 %v227_v61 }
 0x2ac   :  { %v240_v59 = vmul.f32 %v462_v57, %v440_v20 }
 0x2ae   :  { %v246_v60 = vpack.c.bf16 %v241_v58, %v240_v59 }
 0x2b1   :  { %v464_v63 = vpop.eup %463 }
 0x2b2   :  { %v243_v2 = vmul.f32 %v464_v63, %v448_v33 }
 0x2b7   :  { %403 = vmatmul.msk.bf16.gmra.mxu2 %vm155_vm1, %v246_v60 }
 0x2c3   :  { %v224_v62 = vpop.xlane.xlu2 %223 }
 0x2c4   :  { %465 = vrcp.f32 %v224_v62 }
 0x2ca   :  { %v466_v0 = vpop.eup %465 }
 0x2cb   :  { %v242_v1 = vmul.f32 %v466_v0, %v450_v38 }
 0x2cd   :  { %v247_v3 = vpack.c.bf16 %v243_v2, %v242_v1 }
 0x2cf   :  { %404 = vmatmul.msk.bf16.vlgmr.msra.gmra.mxu3 %vm155_vm1, %v247_v3 }
 0x319   :  { %v272_v4 = vpop.f32.mrf.mxu2 }
 0x31a   :  { %v308_v20 = vmul.f32 %v430_v12, %v272_v4 }
 0x31c   :  { %v316_v27 = vsel %vm51_vm0, %v308_v20, 0.0 }
 0x321   :  { %v274_v5 = vpop.f32.mrf.mxu2 }
 0x322   :  { %v309_v21 = vmul.f32 %v430_v12, %v274_v5 }
 0x324   :  { %v323_v28 = vsel %vm51_vm0, %v309_v21, 0.0 }
 0x32a   :  { %v277_v6 = vpop.f32.mrf.mxu2 }
 0x32b   :  { %v310_v17 = vmul.f32 %v431_v11, %v277_v6 }
 0x32d   :  { %v317_v24 = vsel %vm51_vm0, %v310_v17, 0.0 }
 0x32e   :  { %v318_v31 = vadd.f32 %v317_v24, %v316_v27 }
 0x332   :  { %v279_v8 = vpop.f32.mrf.mxu2 }
 0x333   :  { %v311_v18 = vmul.f32 %v431_v11, %v279_v8 }
 0x335   :  { %v324_v25 = vsel %vm51_vm0, %v311_v18, 0.0 }
 0x336   :  { %v325_v32 = vadd.f32 %v324_v25, %v323_v28 }
 0x33a   :  { %v282_v10 = vpop.f32.mrf.mxu2 }
 0x33b   :  { %v312_v22 = vmul.f32 %v432_v13, %v282_v10 }
 0x33d   :  { %v319_v29 = vsel %vm51_vm0, %v312_v22, 0.0 }
 0x33e   :  { %v320_v36 = vadd.f32 %v319_v29, %v318_v31 }
 0x342   :  { %v284_v14 = vpop.f32.mrf.mxu2 }
 0x343   :  { %v313_v23 = vmul.f32 %v432_v13, %v284_v14 }
 0x345   :  { %v326_v30 = vsel %vm51_vm0, %v313_v23, 0.0 }
 0x346   :  { %v327_v37 = vadd.f32 %v326_v30, %v325_v32 }
 0x352   :  { %v287_v15 = vpop.f32.mrf.mxu3 }
 0x353   :  { %v314_v26 = vmul.f32 %v433_v19, %v287_v15 }
 0x355   :  { %v321_v34 = vsel %vm51_vm0, %v314_v26, 0.0 }
 0x356   :  { %v322_v16 = vadd.f32 %v321_v34, %v320_v36 }
 0x35a   :  { %v289_v33 = vpop.f32.mrf.mxu3 }
 0x35b   :  { %v315_v35 = vmul.f32 %v433_v19, %v289_v33 }
 0x35d   :  { %v328_v38 = vsel %vm51_vm0, %v315_v35, 0.0 }
 0x35e   :  { %v329_v39 = vadd.f32 %v328_v38, %v327_v37 }
 0x360   :  { %v330_v40 = vpack.c.bf16 %v329_v39, %v322_v16 }
 0x362   :  { %413 = vmatmul.msk.bf16.vlgmr.msrb.gmra.mxu3 %vm51_vm0, %v330_v40 }
 0x3e5   :  { %v363_v42 = vpop.f32.mrf.mxu3 }
 0x3e6   :  { %v364_v43 = vadd.f32 %v434_v41, %v363_v42 }
 0x3e8   :  { %368 = vst.msk [vmem:[#allocation2] sm:$0xff] %vm51_vm0, %v364_v43 }
 0x3ed   :  { %v365_v44 = vpop.f32.mrf.mxu3 }
 0x3ee   :  { %v366_v45 = vadd.f32 %v434_v41, %v365_v44 }
 0x3f0   :  { %369 = vst.msk [vmem:[#allocation2 + $0x8] sm:$0xff] %vm51_vm0, %v366_v45 }
 0x3f1   :  { %382 = dma.vmem_to_hbm [thread:$0]  %s375_s20, 256, %s377_s23, [#allocation3], %s496_s24, %s496_s24, %s497_s25  }
 0x3f2   :  { %491 = dma.done.wait [#allocation3], 256  }
 0x3f3   :  { %492 = vsyncadd [#allocation3], 4294967040 }
 0x3f4   :  { %387 = vsyncpa [#allocation3], 1 }

</bundles_post_ra>
